<compile_context>
chip_gen: v6e
topology: v6e:2x2x1
jax: 0.10.0
libtpu: 0.0.40
codegen_flags: <defaults>
</compile_context>

<pallas_src>
import functools

import jax
import jax.numpy as jnp
from jax.experimental import pallas as pl
from jax.experimental.pallas import tpu as pltpu


def lstm_kernel(x_ref, wih_ref, whh_ref, b_ref, h0_ref, c0_ref, out_ref,
                *, seq_len, hidden_size):
    """Whole LSTM recurrence for one batch tile in a single kernel invocation."""
    T = seq_len
    H = hidden_size
    G = 4 * H
    _, Bt, E = x_ref.shape          # (T, B_tile, E), time-major

    # ---- Prologue (outside the recurrence) --------------------------------
    # Hoisted input projection, one big-M MXU matmul with the bias folded in:
    #   xp[t, b, :] = x[t, b, :] @ W_ih^T + (b_ih + b_hh)
    x_flat = x_ref[...].reshape(T * Bt, E)                 # leading-dim merge, layout-free
    xp = jnp.dot(x_flat, wih_ref[...], preferred_element_type=jnp.float32)
    xp = xp + b_ref[...]

    # Column scale folding the sigmoid half-argument into the linear maps:
    #   sigmoid(z) = 0.5 * (1 + tanh(0.5 * z))  for i/f/o ;  tanh(z) for g.
    # Scale the i/f/o gate columns of both the projected input and W_hh by 0.5
    # ONCE here, so the per-step path has no extra pre-tanh multiply.
    lane1 = jax.lax.broadcasted_iota(jnp.int32, (1, G), 1)
    g_col = (lane1 >= 2 * H) & (lane1 < 3 * H)             # 'g' (cell candidate) block
    col_scale = jnp.where(g_col, 1.0, 0.5).astype(jnp.float32)

    xp = (xp * col_scale).reshape(T, Bt, G)                # split leading dim, lanes kept
    whh = whh_ref[...] * col_scale                         # (H, 4H), scaled once

    # Post-tanh select mask at (Bt, G); hoisted so the iota is not re-emitted.
    lane = jax.lax.broadcasted_iota(jnp.int32, (Bt, G), 1)
    g_mask = (lane >= 2 * H) & (lane < 3 * H)

    h = h0_ref[...]                                        # (Bt, H)
    c = c0_ref[...]                                        # (Bt, H)

    # ---- Recurrence: fully unrolled (T is a small, static trip count) -----
    # Per step the serial critical path is one (Bt,H)@(H,4H) MXU matmul, one
    # full-width tanh serving all four gates, a vselect, and the c/h update.
    for t in range(T):
        z = xp[t] + jnp.dot(h, whh, preferred_element_type=jnp.float32)
        tz = jnp.tanh(z)                                   # one EUP op, all 4 gates
        act = jnp.where(g_mask, tz, 0.5 + 0.5 * tz)        # [ i | f | g | o ]
        # Static lane extracts to align gate blocks with the (Bt, H) state
        # (XLU lane-selects riding in an otherwise idle slot).
        i_g = act[:, 0 * H:1 * H]
        f_g = act[:, 1 * H:2 * H]
        g_g = act[:, 2 * H:3 * H]
        o_g = act[:, 3 * H:4 * H]
        c = f_g * c + i_g * g_g
        h = o_g * jnp.tanh(c)

    out_ref[...] = h.astype(out_ref.dtype)


def _pick_batch_tile(batch, max_tile=256):
    """Largest multiple-of-8 tile <= max_tile dividing batch (else the full batch)."""
    if batch <= max_tile:
        return batch
    for t in range(max_tile - max_tile % 8, 7, -8):
        if batch % t == 0:
            return t
    return batch


def lstm_char_encoder(x, w_ih, w_hh, b_ih, b_hh, h0, c0, *, batch_tile=None):
    """x: [B, T, E] float32 -> [B, H, 1] (matches hidden[0].squeeze().unsqueeze(2))."""
    B, T, E = x.shape
    H = w_hh.shape[1]
    G = 4 * H

    if batch_tile is None:
        batch_tile = _pick_batch_tile(B)
    assert B % batch_tile == 0 and (batch_tile == B or batch_tile % 8 == 0)

    # Time-major layout so each unrolled step reads a contiguous sublane slab.
    xt = jnp.transpose(x, (1, 0, 2))            # (T, B, E) — layout plumbing only
    wih_t = w_ih.T                              # (E, 4H)
    whh_t = w_hh.T                              # (H, 4H)
    b = (b_ih + b_hh).reshape(1, G)             # (1, 4H)

    kernel = functools.partial(lstm_kernel, seq_len=T, hidden_size=H)

    h_last = pl.pallas_call(
        kernel,
        out_shape=jax.ShapeDtypeStruct((B, H), jnp.float32),
        grid_spec=pltpu.PrefetchScalarGridSpec(
            num_scalar_prefetch=0,
            grid=(B // batch_tile,),            # independent batch tiles
            in_specs=[
                pl.BlockSpec((T, batch_tile, E), lambda i: (0, i, 0)),  # x (time-major)
                pl.BlockSpec((E, G), lambda i: (0, 0)),                 # W_ih^T
                pl.BlockSpec((H, G), lambda i: (0, 0)),                 # W_hh^T
                pl.BlockSpec((1, G), lambda i: (0, 0)),                 # bias
                pl.BlockSpec((batch_tile, H), lambda i: (i, 0)),        # h0
                pl.BlockSpec((batch_tile, H), lambda i: (i, 0)),        # c0
            ],
            out_specs=pl.BlockSpec((batch_tile, H), lambda i: (i, 0)),
        ),
        compiler_params=pltpu.CompilerParams(
            dimension_semantics=("parallel",)),   # shard batch tiles across TCs
    )(xt, wih_t, whh_t, b, h0, c0)

    # PyTorch's hidden[0].squeeze().unsqueeze(2) == [B, H, 1] for B > 1.
    # TODO(synk): for B == 1 PyTorch's .squeeze() would also drop the batch dim.
    return h_last[:, :, None]


def _xavier_normal(key, shape):
    fan_out, fan_in = shape
    std = (2.0 / (fan_in + fan_out)) ** 0.5
    return std * jax.random.normal(key, shape, dtype=jnp.float32)


def _orthogonal_rows(key, rows, cols):
    """Mimics torch.nn.init.orthogonal_ on a (rows, cols) matrix."""
    n, m = max(rows, cols), min(rows, cols)
    a = jax.random.normal(key, (n, m), dtype=jnp.float32)
    q, r = jnp.linalg.qr(a)
    q = q * jnp.sign(jnp.diag(r))
    if rows < cols:
        q = q.T
    return q


def _reference_lstm(x, w_ih, w_hh, b_ih, b_hh, h0, c0):
    H = w_hh.shape[1]

    def step(carry, x_t):
        h, c = carry
        gates = x_t @ w_ih.T + h @ w_hh.T + b_ih + b_hh
        i = jax.nn.sigmoid(gates[:, 0 * H:1 * H])
        f = jax.nn.sigmoid(gates[:, 1 * H:2 * H])
        g = jnp.tanh(gates[:, 2 * H:3 * H])
        o = jax.nn.sigmoid(gates[:, 3 * H:4 * H])
        c = f * c + i * g
        h = o * jnp.tanh(c)
        return (h, c), None

    (h, _), _ = jax.lax.scan(step, (h0, c0), jnp.transpose(x, (1, 0, 2)))
    return h[:, :, None]


if __name__ == "__main__":
    # Small shapes consistent with the module: char_emb_size = hidden = 32,
    # B = n_batch*n_word = 8, word_length = 8.
    B, T, E = 8, 8, 32
    H = E                                    # hidden_size defaults to char_emb_size

    key = jax.random.PRNGKey(0)
    k_x, k_wih, k_whh, k_bih, k_bhh, k_h0, k_c0 = jax.random.split(key, 7)

    x = jax.random.normal(k_x, (B, T, E), dtype=jnp.float32)

    # LSTM parameters (xavier-normal weights, small-normal biases), deterministic.
    w_ih = _xavier_normal(k_wih, (4 * H, E))
    w_hh = _xavier_normal(k_whh, (4 * H, H))
    b_ih = 0.01 * jax.random.normal(k_bih, (4 * H,), dtype=jnp.float32)
    b_hh = 0.01 * jax.random.normal(k_bhh, (4 * H,), dtype=jnp.float32)

    # Orthogonal h0/c0 (torch flattens (1, B, H) -> (1, B*H) before orthogonal_).
    h0 = _orthogonal_rows(k_h0, 1, B * H).reshape(B, H).astype(jnp.float32)
    c0 = _orthogonal_rows(k_c0, 1, B * H).reshape(B, H).astype(jnp.float32)

    out = lstm_char_encoder(x, w_ih, w_hh, b_ih, b_hh, h0, c0)
    out = jax.block_until_ready(out)

    assert out.shape == (B, H, 1), out.shape

    ref = _reference_lstm(x, w_ih, w_hh, b_ih, b_hh, h0, c0)
    assert jnp.all(jnp.isfinite(out))
    assert jnp.allclose(out, ref, rtol=1e-2, atol=1e-2)

    print("KERNEL_OK")
</pallas_src>

<mosaic_0001>
module attributes {stable_mosaic.version = 11 : i64} {
  func.func @lstm_kernel(%arg0: i32, %arg1: memref<8x8x32xf32, #tpu.memory_space<vmem>>, %arg2: memref<32x128xf32, #tpu.memory_space<vmem>>, %arg3: memref<32x128xf32, #tpu.memory_space<vmem>>, %arg4: memref<1x128xf32, #tpu.memory_space<vmem>>, %arg5: memref<8x32xf32, #tpu.memory_space<vmem>>, %arg6: memref<8x32xf32, #tpu.memory_space<vmem>>, %arg7: memref<8x32xf32, #tpu.memory_space<vmem>>) attributes {dimension_semantics = [#tpu.dimension_semantics<parallel>], iteration_bounds = array<i64: 1>, scalar_prefetch = 0 : i64, scratch_operands = 0 : i64, tpu.core_type = #tpu.core_type<tc>, window_params = [{transform_indices = @transform_0, window_bounds = array<i64: 8, 8, 32>}, {pipeline_mode = #tpu.pipeline_mode<synchronous>, transform_indices = @transform_1, window_bounds = array<i64: 32, 128>}, {pipeline_mode = #tpu.pipeline_mode<synchronous>, transform_indices = @transform_2, window_bounds = array<i64: 32, 128>}, {pipeline_mode = #tpu.pipeline_mode<synchronous>, transform_indices = @transform_3, window_bounds = array<i64: 1, 128>}, {transform_indices = @transform_4, window_bounds = array<i64: 8, 32>}, {transform_indices = @transform_5, window_bounds = array<i64: 8, 32>}, {transform_indices = @transform_6, window_bounds = array<i64: 8, 32>}]} {
    %c0 = arith.constant 0 : index
    %c0_0 = arith.constant 0 : index
    %c0_1 = arith.constant 0 : index
    %0 = vector.load %arg1[%c0, %c0_0, %c0_1] : memref<8x8x32xf32, #tpu.memory_space<vmem>>, vector<8x8x32xf32>
    %1 = vector.shape_cast %0 : vector<8x8x32xf32> to vector<64x32xf32>
    %c0_2 = arith.constant 0 : index
    %c0_3 = arith.constant 0 : index
    %2 = vector.load %arg2[%c0_2, %c0_3] : memref<32x128xf32, #tpu.memory_space<vmem>>, vector<32x128xf32>
    %cst = arith.constant dense<0.000000e+00> : vector<64x128xf32>
    %3 = tpu.matmul %1, %2, %cst {dimension_numbers = #tpu.dot_dimension_numbers<[1], [0], [0], [1], [0, 0, 1, 1], [], []>} : vector<64x32xf32>, vector<32x128xf32>, vector<64x128xf32> -> vector<64x128xf32>
    %c0_4 = arith.constant 0 : index
    %c0_5 = arith.constant 0 : index
    %4 = vector.load %arg4[%c0_4, %c0_5] : memref<1x128xf32, #tpu.memory_space<vmem>>, vector<1x128xf32>
    %5 = vector.broadcast %4 : vector<1x128xf32> to vector<64x128xf32>
    %6 = arith.addf %3, %5 : vector<64x128xf32>
    %7 = tpu.iota {dimensions = array<i32: 1>} : vector<1x128xi32>
    %c64_i32 = arith.constant 64 : i32
    %8 = vector.broadcast %c64_i32 : i32 to vector<1x128xi32>
    %9 = arith.cmpi sge, %7, %8 : vector<1x128xi32>
    %c96_i32 = arith.constant 96 : i32
    %10 = vector.broadcast %c96_i32 : i32 to vector<1x128xi32>
    %11 = arith.cmpi slt, %7, %10 : vector<1x128xi32>
    %12 = arith.andi %9, %11 : vector<1x128xi1>
    %cst_6 = arith.constant 1.000000e+00 : f32
    %cst_7 = arith.constant 5.000000e-01 : f32
    %13 = vector.broadcast %cst_6 : f32 to vector<1x128xf32>
    %14 = vector.broadcast %cst_7 : f32 to vector<1x128xf32>
    %15 = arith.select %12, %13, %14 : vector<1x128xi1>, vector<1x128xf32>
    %16 = vector.broadcast %15 : vector<1x128xf32> to vector<64x128xf32>
    %17 = arith.mulf %6, %16 : vector<64x128xf32>
    %18 = vector.shape_cast %17 : vector<64x128xf32> to vector<8x8x128xf32>
    %c0_8 = arith.constant 0 : index
    %c0_9 = arith.constant 0 : index
    %19 = vector.load %arg3[%c0_8, %c0_9] : memref<32x128xf32, #tpu.memory_space<vmem>>, vector<32x128xf32>
    %20 = vector.broadcast %15 : vector<1x128xf32> to vector<32x128xf32>
    %21 = arith.mulf %19, %20 : vector<32x128xf32>
    %22 = tpu.iota {dimensions = array<i32: 1>} : vector<8x128xi32>
    %c64_i32_10 = arith.constant 64 : i32
    %23 = vector.broadcast %c64_i32_10 : i32 to vector<8x128xi32>
    %24 = arith.cmpi sge, %22, %23 : vector<8x128xi32>
    %c96_i32_11 = arith.constant 96 : i32
    %25 = vector.broadcast %c96_i32_11 : i32 to vector<8x128xi32>
    %26 = arith.cmpi slt, %22, %25 : vector<8x128xi32>
    %27 = arith.andi %24, %26 : vector<8x128xi1>
    %c0_12 = arith.constant 0 : index
    %c0_13 = arith.constant 0 : index
    %28 = vector.load %arg5[%c0_12, %c0_13] : memref<8x32xf32, #tpu.memory_space<vmem>>, vector<8x32xf32>
    %c0_14 = arith.constant 0 : index
    %c0_15 = arith.constant 0 : index
    %29 = vector.load %arg6[%c0_14, %c0_15] : memref<8x32xf32, #tpu.memory_space<vmem>>, vector<8x32xf32>
    %30 = vector.extract_strided_slice %18 {offsets = [0, 0, 0], sizes = [1, 8, 128], strides = [1, 1, 1]} : vector<8x8x128xf32> to vector<1x8x128xf32>
    %31 = vector.shape_cast %30 : vector<1x8x128xf32> to vector<8x128xf32>
    %cst_16 = arith.constant dense<0.000000e+00> : vector<8x128xf32>
    %32 = tpu.matmul %28, %21, %cst_16 {dimension_numbers = #tpu.dot_dimension_numbers<[1], [0], [0], [1], [0, 0, 1, 1], [], []>} : vector<8x32xf32>, vector<32x128xf32>, vector<8x128xf32> -> vector<8x128xf32>
    %33 = arith.addf %31, %32 : vector<8x128xf32>
    %34 = math.tanh %33 : vector<8x128xf32>
    %cst_17 = arith.constant 5.000000e-01 : f32
    %35 = vector.broadcast %cst_17 : f32 to vector<8x128xf32>
    %36 = arith.mulf %35, %34 : vector<8x128xf32>
    %cst_18 = arith.constant 5.000000e-01 : f32
    %37 = vector.broadcast %cst_18 : f32 to vector<8x128xf32>
    %38 = arith.addf %37, %36 : vector<8x128xf32>
    %39 = arith.select %27, %34, %38 : vector<8x128xi1>, vector<8x128xf32>
    %40 = vector.extract_strided_slice %39 {offsets = [0, 0], sizes = [8, 32], strides = [1, 1]} : vector<8x128xf32> to vector<8x32xf32>
    %41 = vector.extract_strided_slice %39 {offsets = [0, 32], sizes = [8, 32], strides = [1, 1]} : vector<8x128xf32> to vector<8x32xf32>
    %42 = vector.extract_strided_slice %39 {offsets = [0, 64], sizes = [8, 32], strides = [1, 1]} : vector<8x128xf32> to vector<8x32xf32>
    %43 = vector.extract_strided_slice %39 {offsets = [0, 96], sizes = [8, 32], strides = [1, 1]} : vector<8x128xf32> to vector<8x32xf32>
    %44 = arith.mulf %41, %29 : vector<8x32xf32>
    %45 = arith.mulf %40, %42 : vector<8x32xf32>
    %46 = arith.addf %44, %45 : vector<8x32xf32>
    %47 = math.tanh %46 : vector<8x32xf32>
    %48 = arith.mulf %43, %47 : vector<8x32xf32>
    %49 = vector.extract_strided_slice %18 {offsets = [1, 0, 0], sizes = [1, 8, 128], strides = [1, 1, 1]} : vector<8x8x128xf32> to vector<1x8x128xf32>
    %50 = vector.shape_cast %49 : vector<1x8x128xf32> to vector<8x128xf32>
    %cst_19 = arith.constant dense<0.000000e+00> : vector<8x128xf32>
    %51 = tpu.matmul %48, %21, %cst_19 {dimension_numbers = #tpu.dot_dimension_numbers<[1], [0], [0], [1], [0, 0, 1, 1], [], []>} : vector<8x32xf32>, vector<32x128xf32>, vector<8x128xf32> -> vector<8x128xf32>
    %52 = arith.addf %50, %51 : vector<8x128xf32>
    %53 = math.tanh %52 : vector<8x128xf32>
    %cst_20 = arith.constant 5.000000e-01 : f32
    %54 = vector.broadcast %cst_20 : f32 to vector<8x128xf32>
    %55 = arith.mulf %54, %53 : vector<8x128xf32>
    %cst_21 = arith.constant 5.000000e-01 : f32
    %56 = vector.broadcast %cst_21 : f32 to vector<8x128xf32>
    %57 = arith.addf %56, %55 : vector<8x128xf32>
    %58 = arith.select %27, %53, %57 : vector<8x128xi1>, vector<8x128xf32>
    %59 = vector.extract_strided_slice %58 {offsets = [0, 0], sizes = [8, 32], strides = [1, 1]} : vector<8x128xf32> to vector<8x32xf32>
    %60 = vector.extract_strided_slice %58 {offsets = [0, 32], sizes = [8, 32], strides = [1, 1]} : vector<8x128xf32> to vector<8x32xf32>
    %61 = vector.extract_strided_slice %58 {offsets = [0, 64], sizes = [8, 32], strides = [1, 1]} : vector<8x128xf32> to vector<8x32xf32>
    %62 = vector.extract_strided_slice %58 {offsets = [0, 96], sizes = [8, 32], strides = [1, 1]} : vector<8x128xf32> to vector<8x32xf32>
    %63 = arith.mulf %60, %46 : vector<8x32xf32>
    %64 = arith.mulf %59, %61 : vector<8x32xf32>
    %65 = arith.addf %63, %64 : vector<8x32xf32>
    %66 = math.tanh %65 : vector<8x32xf32>
    %67 = arith.mulf %62, %66 : vector<8x32xf32>
    %68 = vector.extract_strided_slice %18 {offsets = [2, 0, 0], sizes = [1, 8, 128], strides = [1, 1, 1]} : vector<8x8x128xf32> to vector<1x8x128xf32>
    %69 = vector.shape_cast %68 : vector<1x8x128xf32> to vector<8x128xf32>
    %cst_22 = arith.constant dense<0.000000e+00> : vector<8x128xf32>
    %70 = tpu.matmul %67, %21, %cst_22 {dimension_numbers = #tpu.dot_dimension_numbers<[1], [0], [0], [1], [0, 0, 1, 1], [], []>} : vector<8x32xf32>, vector<32x128xf32>, vector<8x128xf32> -> vector<8x128xf32>
    %71 = arith.addf %69, %70 : vector<8x128xf32>
    %72 = math.tanh %71 : vector<8x128xf32>
    %cst_23 = arith.constant 5.000000e-01 : f32
    %73 = vector.broadcast %cst_23 : f32 to vector<8x128xf32>
    %74 = arith.mulf %73, %72 : vector<8x128xf32>
    %cst_24 = arith.constant 5.000000e-01 : f32
    %75 = vector.broadcast %cst_24 : f32 to vector<8x128xf32>
    %76 = arith.addf %75, %74 : vector<8x128xf32>
    %77 = arith.select %27, %72, %76 : vector<8x128xi1>, vector<8x128xf32>
    %78 = vector.extract_strided_slice %77 {offsets = [0, 0], sizes = [8, 32], strides = [1, 1]} : vector<8x128xf32> to vector<8x32xf32>
    %79 = vector.extract_strided_slice %77 {offsets = [0, 32], sizes = [8, 32], strides = [1, 1]} : vector<8x128xf32> to vector<8x32xf32>
    %80 = vector.extract_strided_slice %77 {offsets = [0, 64], sizes = [8, 32], strides = [1, 1]} : vector<8x128xf32> to vector<8x32xf32>
    %81 = vector.extract_strided_slice %77 {offsets = [0, 96], sizes = [8, 32], strides = [1, 1]} : vector<8x128xf32> to vector<8x32xf32>
    %82 = arith.mulf %79, %65 : vector<8x32xf32>
    %83 = arith.mulf %78, %80 : vector<8x32xf32>
    %84 = arith.addf %82, %83 : vector<8x32xf32>
    %85 = math.tanh %84 : vector<8x32xf32>
    %86 = arith.mulf %81, %85 : vector<8x32xf32>
    %87 = vector.extract_strided_slice %18 {offsets = [3, 0, 0], sizes = [1, 8, 128], strides = [1, 1, 1]} : vector<8x8x128xf32> to vector<1x8x128xf32>
    %88 = vector.shape_cast %87 : vector<1x8x128xf32> to vector<8x128xf32>
    %cst_25 = arith.constant dense<0.000000e+00> : vector<8x128xf32>
    %89 = tpu.matmul %86, %21, %cst_25 {dimension_numbers = #tpu.dot_dimension_numbers<[1], [0], [0], [1], [0, 0, 1, 1], [], []>} : vector<8x32xf32>, vector<32x128xf32>, vector<8x128xf32> -> vector<8x128xf32>
    %90 = arith.addf %88, %89 : vector<8x128xf32>
    %91 = math.tanh %90 : vector<8x128xf32>
    %cst_26 = arith.constant 5.000000e-01 : f32
    %92 = vector.broadcast %cst_26 : f32 to vector<8x128xf32>
    %93 = arith.mulf %92, %91 : vector<8x128xf32>
    %cst_27 = arith.constant 5.000000e-01 : f32
    %94 = vector.broadcast %cst_27 : f32 to vector<8x128xf32>
    %95 = arith.addf %94, %93 : vector<8x128xf32>
    %96 = arith.select %27, %91, %95 : vector<8x128xi1>, vector<8x128xf32>
    %97 = vector.extract_strided_slice %96 {offsets = [0, 0], sizes = [8, 32], strides = [1, 1]} : vector<8x128xf32> to vector<8x32xf32>
    %98 = vector.extract_strided_slice %96 {offsets = [0, 32], sizes = [8, 32], strides = [1, 1]} : vector<8x128xf32> to vector<8x32xf32>
    %99 = vector.extract_strided_slice %96 {offsets = [0, 64], sizes = [8, 32], strides = [1, 1]} : vector<8x128xf32> to vector<8x32xf32>
    %100 = vector.extract_strided_slice %96 {offsets = [0, 96], sizes = [8, 32], strides = [1, 1]} : vector<8x128xf32> to vector<8x32xf32>
    %101 = arith.mulf %98, %84 : vector<8x32xf32>
    %102 = arith.mulf %97, %99 : vector<8x32xf32>
    %103 = arith.addf %101, %102 : vector<8x32xf32>
    %104 = math.tanh %103 : vector<8x32xf32>
    %105 = arith.mulf %100, %104 : vector<8x32xf32>
    %106 = vector.extract_strided_slice %18 {offsets = [4, 0, 0], sizes = [1, 8, 128], strides = [1, 1, 1]} : vector<8x8x128xf32> to vector<1x8x128xf32>
    %107 = vector.shape_cast %106 : vector<1x8x128xf32> to vector<8x128xf32>
    %cst_28 = arith.constant dense<0.000000e+00> : vector<8x128xf32>
    %108 = tpu.matmul %105, %21, %cst_28 {dimension_numbers = #tpu.dot_dimension_numbers<[1], [0], [0], [1], [0, 0, 1, 1], [], []>} : vector<8x32xf32>, vector<32x128xf32>, vector<8x128xf32> -> vector<8x128xf32>
    %109 = arith.addf %107, %108 : vector<8x128xf32>
    %110 = math.tanh %109 : vector<8x128xf32>
    %cst_29 = arith.constant 5.000000e-01 : f32
    %111 = vector.broadcast %cst_29 : f32 to vector<8x128xf32>
    %112 = arith.mulf %111, %110 : vector<8x128xf32>
    %cst_30 = arith.constant 5.000000e-01 : f32
    %113 = vector.broadcast %cst_30 : f32 to vector<8x128xf32>
    %114 = arith.addf %113, %112 : vector<8x128xf32>
    %115 = arith.select %27, %110, %114 : vector<8x128xi1>, vector<8x128xf32>
    %116 = vector.extract_strided_slice %115 {offsets = [0, 0], sizes = [8, 32], strides = [1, 1]} : vector<8x128xf32> to vector<8x32xf32>
    %117 = vector.extract_strided_slice %115 {offsets = [0, 32], sizes = [8, 32], strides = [1, 1]} : vector<8x128xf32> to vector<8x32xf32>
    %118 = vector.extract_strided_slice %115 {offsets = [0, 64], sizes = [8, 32], strides = [1, 1]} : vector<8x128xf32> to vector<8x32xf32>
    %119 = vector.extract_strided_slice %115 {offsets = [0, 96], sizes = [8, 32], strides = [1, 1]} : vector<8x128xf32> to vector<8x32xf32>
    %120 = arith.mulf %117, %103 : vector<8x32xf32>
    %121 = arith.mulf %116, %118 : vector<8x32xf32>
    %122 = arith.addf %120, %121 : vector<8x32xf32>
    %123 = math.tanh %122 : vector<8x32xf32>
    %124 = arith.mulf %119, %123 : vector<8x32xf32>
    %125 = vector.extract_strided_slice %18 {offsets = [5, 0, 0], sizes = [1, 8, 128], strides = [1, 1, 1]} : vector<8x8x128xf32> to vector<1x8x128xf32>
    %126 = vector.shape_cast %125 : vector<1x8x128xf32> to vector<8x128xf32>
    %cst_31 = arith.constant dense<0.000000e+00> : vector<8x128xf32>
    %127 = tpu.matmul %124, %21, %cst_31 {dimension_numbers = #tpu.dot_dimension_numbers<[1], [0], [0], [1], [0, 0, 1, 1], [], []>} : vector<8x32xf32>, vector<32x128xf32>, vector<8x128xf32> -> vector<8x128xf32>
    %128 = arith.addf %126, %127 : vector<8x128xf32>
    %129 = math.tanh %128 : vector<8x128xf32>
    %cst_32 = arith.constant 5.000000e-01 : f32
    %130 = vector.broadcast %cst_32 : f32 to vector<8x128xf32>
    %131 = arith.mulf %130, %129 : vector<8x128xf32>
    %cst_33 = arith.constant 5.000000e-01 : f32
    %132 = vector.broadcast %cst_33 : f32 to vector<8x128xf32>
    %133 = arith.addf %132, %131 : vector<8x128xf32>
    %134 = arith.select %27, %129, %133 : vector<8x128xi1>, vector<8x128xf32>
    %135 = vector.extract_strided_slice %134 {offsets = [0, 0], sizes = [8, 32], strides = [1, 1]} : vector<8x128xf32> to vector<8x32xf32>
    %136 = vector.extract_strided_slice %134 {offsets = [0, 32], sizes = [8, 32], strides = [1, 1]} : vector<8x128xf32> to vector<8x32xf32>
    %137 = vector.extract_strided_slice %134 {offsets = [0, 64], sizes = [8, 32], strides = [1, 1]} : vector<8x128xf32> to vector<8x32xf32>
    %138 = vector.extract_strided_slice %134 {offsets = [0, 96], sizes = [8, 32], strides = [1, 1]} : vector<8x128xf32> to vector<8x32xf32>
    %139 = arith.mulf %136, %122 : vector<8x32xf32>
    %140 = arith.mulf %135, %137 : vector<8x32xf32>
    %141 = arith.addf %139, %140 : vector<8x32xf32>
    %142 = math.tanh %141 : vector<8x32xf32>
    %143 = arith.mulf %138, %142 : vector<8x32xf32>
    %144 = vector.extract_strided_slice %18 {offsets = [6, 0, 0], sizes = [1, 8, 128], strides = [1, 1, 1]} : vector<8x8x128xf32> to vector<1x8x128xf32>
    %145 = vector.shape_cast %144 : vector<1x8x128xf32> to vector<8x128xf32>
    %cst_34 = arith.constant dense<0.000000e+00> : vector<8x128xf32>
    %146 = tpu.matmul %143, %21, %cst_34 {dimension_numbers = #tpu.dot_dimension_numbers<[1], [0], [0], [1], [0, 0, 1, 1], [], []>} : vector<8x32xf32>, vector<32x128xf32>, vector<8x128xf32> -> vector<8x128xf32>
    %147 = arith.addf %145, %146 : vector<8x128xf32>
    %148 = math.tanh %147 : vector<8x128xf32>
    %cst_35 = arith.constant 5.000000e-01 : f32
    %149 = vector.broadcast %cst_35 : f32 to vector<8x128xf32>
    %150 = arith.mulf %149, %148 : vector<8x128xf32>
    %cst_36 = arith.constant 5.000000e-01 : f32
    %151 = vector.broadcast %cst_36 : f32 to vector<8x128xf32>
    %152 = arith.addf %151, %150 : vector<8x128xf32>
    %153 = arith.select %27, %148, %152 : vector<8x128xi1>, vector<8x128xf32>
    %154 = vector.extract_strided_slice %153 {offsets = [0, 0], sizes = [8, 32], strides = [1, 1]} : vector<8x128xf32> to vector<8x32xf32>
    %155 = vector.extract_strided_slice %153 {offsets = [0, 32], sizes = [8, 32], strides = [1, 1]} : vector<8x128xf32> to vector<8x32xf32>
    %156 = vector.extract_strided_slice %153 {offsets = [0, 64], sizes = [8, 32], strides = [1, 1]} : vector<8x128xf32> to vector<8x32xf32>
    %157 = vector.extract_strided_slice %153 {offsets = [0, 96], sizes = [8, 32], strides = [1, 1]} : vector<8x128xf32> to vector<8x32xf32>
    %158 = arith.mulf %155, %141 : vector<8x32xf32>
    %159 = arith.mulf %154, %156 : vector<8x32xf32>
    %160 = arith.addf %158, %159 : vector<8x32xf32>
    %161 = math.tanh %160 : vector<8x32xf32>
    %162 = arith.mulf %157, %161 : vector<8x32xf32>
    %163 = vector.extract_strided_slice %18 {offsets = [7, 0, 0], sizes = [1, 8, 128], strides = [1, 1, 1]} : vector<8x8x128xf32> to vector<1x8x128xf32>
    %164 = vector.shape_cast %163 : vector<1x8x128xf32> to vector<8x128xf32>
    %cst_37 = arith.constant dense<0.000000e+00> : vector<8x128xf32>
    %165 = tpu.matmul %162, %21, %cst_37 {dimension_numbers = #tpu.dot_dimension_numbers<[1], [0], [0], [1], [0, 0, 1, 1], [], []>} : vector<8x32xf32>, vector<32x128xf32>, vector<8x128xf32> -> vector<8x128xf32>
    %166 = arith.addf %164, %165 : vector<8x128xf32>
    %167 = math.tanh %166 : vector<8x128xf32>
    %cst_38 = arith.constant 5.000000e-01 : f32
    %168 = vector.broadcast %cst_38 : f32 to vector<8x128xf32>
    %169 = arith.mulf %168, %167 : vector<8x128xf32>
    %cst_39 = arith.constant 5.000000e-01 : f32
    %170 = vector.broadcast %cst_39 : f32 to vector<8x128xf32>
    %171 = arith.addf %170, %169 : vector<8x128xf32>
    %172 = arith.select %27, %167, %171 : vector<8x128xi1>, vector<8x128xf32>
    %173 = vector.extract_strided_slice %172 {offsets = [0, 0], sizes = [8, 32], strides = [1, 1]} : vector<8x128xf32> to vector<8x32xf32>
    %174 = vector.extract_strided_slice %172 {offsets = [0, 32], sizes = [8, 32], strides = [1, 1]} : vector<8x128xf32> to vector<8x32xf32>
    %175 = vector.extract_strided_slice %172 {offsets = [0, 64], sizes = [8, 32], strides = [1, 1]} : vector<8x128xf32> to vector<8x32xf32>
    %176 = vector.extract_strided_slice %172 {offsets = [0, 96], sizes = [8, 32], strides = [1, 1]} : vector<8x128xf32> to vector<8x32xf32>
    %177 = arith.mulf %174, %160 : vector<8x32xf32>
    %178 = arith.mulf %173, %175 : vector<8x32xf32>
    %179 = arith.addf %177, %178 : vector<8x32xf32>
    %180 = math.tanh %179 : vector<8x32xf32>
    %181 = arith.mulf %176, %180 : vector<8x32xf32>
    %c0_40 = arith.constant 0 : index
    %c0_41 = arith.constant 0 : index
    %182 = vector.load %arg7[%c0_40, %c0_41] : memref<8x32xf32, #tpu.memory_space<vmem>>, vector<8x32xf32>
    tpu.vector_store %arg7[%c0_40, %c0_41], %181 {strides = array<i32>} : memref<8x32xf32, #tpu.memory_space<vmem>>, vector<8x32xf32>,
    return
  }
  func.func @transform_0(%arg0: i32) -> (i32, i32, i32) {
    %c0_i32 = arith.constant 0 : i32
    %c0_i32_0 = arith.constant 0 : i32
    %c0_i32_1 = arith.constant 0 : i32
    return %c0_i32, %arg0, %c0_i32_0 : i32, i32, i32
  }
  func.func @transform_1(%arg0: i32) -> (i32, i32) {
    %c0_i32 = arith.constant 0 : i32
    %c0_i32_0 = arith.constant 0 : i32
    %c0_i32_1 = arith.constant 0 : i32
    return %c0_i32, %c0_i32_0 : i32, i32
  }
  func.func @transform_2(%arg0: i32) -> (i32, i32) {
    %c0_i32 = arith.constant 0 : i32
    %c0_i32_0 = arith.constant 0 : i32
    %c0_i32_1 = arith.constant 0 : i32
    return %c0_i32, %c0_i32_0 : i32, i32
  }
  func.func @transform_3(%arg0: i32) -> (i32, i32) {
    %c0_i32 = arith.constant 0 : i32
    %c0_i32_0 = arith.constant 0 : i32
    %c0_i32_1 = arith.constant 0 : i32
    return %c0_i32, %c0_i32_0 : i32, i32
  }
  func.func @transform_4(%arg0: i32) -> (i32, i32) {
    %c0_i32 = arith.constant 0 : i32
    %c0_i32_0 = arith.constant 0 : i32
    return %arg0, %c0_i32 : i32, i32
  }
  func.func @transform_5(%arg0: i32) -> (i32, i32) {
    %c0_i32 = arith.constant 0 : i32
    %c0_i32_0 = arith.constant 0 : i32
    return %arg0, %c0_i32 : i32, i32
  }
  func.func @transform_6(%arg0: i32) -> (i32, i32) {
    %c0_i32 = arith.constant 0 : i32
    %c0_i32_0 = arith.constant 0 : i32
    return %arg0, %c0_i32 : i32, i32
  }
}

</mosaic_0001>

<bundles_post_ra>
// kernel: tpu_custom_call.1
= control target key start
LH: loop header
LB: loop body
LE: loop exit
PB: predicated region body
PF: predicated region fallthrough
CT: control target
= control target key end

     0   :  { %11 = vsyncpa [#allocation3], 0  ;;  %s1643_s0 = inlined_call_operand.hbm [shape: f32[8,8,32], index: 0, kind: input, shape index: {}]   ;;  %s1644_s1 = inlined_call_operand.hbm [shape: f32[32,128], index: 1, kind: input, shape index: {}]   ;;  %s1645_s2 = inlined_call_operand.hbm [shape: f32[32,128], index: 2, kind: input, shape index: {}]   ;;  %s1646_s3 = inlined_call_operand.vmem [shape: f32[1,128], index: 3, kind: input, shape index: {}]   ;;  %s1647_s4 = inlined_call_operand.hbm [shape: f32[8,32], index: 4, kind: input, shape index: {}]   ;;  %s1648_s5 = inlined_call_operand.vmem [shape: f32[8,32], index: 5, kind: input, shape index: {}]   ;;  %s1649_s6 = inlined_call_operand.hbm [shape: f32[8,32], index: 6, kind: output, shape index: {}]  }
   0x1   :  { %12 = vsyncpa [#allocation6], 0 }
   0x2   :  { %13 = vsyncpa [#allocation9], 0 }
   0x3   :  { %14 = vsyncpa [#allocation4], 0  ;;  %s1379_s21 = smov [#allocation5]   ;;  %s1380_s23 = smov [#allocation2]  }
   0x4   :  { %s32_s22 = sshll.u32 %s1379_s21, 4  ;;  %s20_s24 = sshll.u32 %s1380_s23, 4  ;;  %s33_s22 = int_to_ptr.vmem [resolvable:$true] %s32_s22  ;;  %s21_s24 = int_to_ptr.vmem [resolvable:$true] %s20_s24 }
   0x5   :  { %s1279_s25 = scalar_lea.vmem %s33_s22, 512  ;;  %p1284_p1 = scmp.lt.s32.totalorder %s33_s22, %s33_s22 }
   0x6   :  { %p1280_p0 = scmp.ne.s32.totalorder %s33_s22, %s1279_s25  ;;  %p1285_p2 = scmp.lt.s32.totalorder %s1279_s25, %s1279_s25 }
   0x8   :  { %p1286_p3 = por %p1285_p2, %p1284_p1 }
   0xa   :  { %p1287_p4 = pnand %p1286_p3, %p1280_p0 }
   0xc   :  { %1290 = shalt.err (!%p1287_p4)
}
   0xd   :  { %s1381_s26 = smov 128   ;;  %s1382_s27 = smov 8  }
   0xe   :  { %38 = dma.hbm_to_vmem [thread:$0]  %s1644_s1, 512, %s33_s22, [#allocation6], %s1381_s26, %s1381_s26, %s1382_s27  }
   0xf   :  { %s1299_s30 = scalar_lea.vmem %s21_s24, 1024  ;;  %p1304_p6 = scmp.lt.s32.totalorder %s21_s24, %s21_s24 }
  0x10   :  { %p1300_p5 = scmp.ne.s32.totalorder %s21_s24, %s1299_s30  ;;  %p1305_p7 = scmp.lt.s32.totalorder %s1299_s30, %s1299_s30 }
  0x12   :  { %p1306_p8 = por %p1305_p7, %p1304_p6 }
  0x14   :  { %p1307_p9 = pnand %p1306_p8, %p1300_p5 }
  0x16   :  { %1310 = shalt.err (!%p1307_p9)
}
  0x17   :  { %26 = dma.hbm_to_vmem [thread:$0]  %s1643_s0, 1024, %s21_s24, [#allocation3], %s1381_s26, %s1381_s26, %s1382_s27  }
  0x18   :  { %s1383_s9 = smov [#allocation7]   ;;  %s1384_s11 = smov [#allocation8]  }
  0x19   :  { %s44_s10 = sshll.u32 %s1383_s9, 4  ;;  %s59_s12 = sshll.u32 %s1384_s11, 4  ;;  %s45_s10 = int_to_ptr.vmem [resolvable:$true] %s44_s10  ;;  %s60_s12 = int_to_ptr.vmem [resolvable:$true] %s59_s12 }
  0x1a   :  { %s1319_s13 = scalar_lea.vmem %s45_s10, 512  ;;  %p1324_p11 = scmp.lt.s32.totalorder %s45_s10, %s45_s10 }
  0x1b   :  { %p1320_p10 = scmp.ne.s32.totalorder %s45_s10, %s1319_s13  ;;  %p1325_p12 = scmp.lt.s32.totalorder %s1319_s13, %s1319_s13 }
  0x1d   :  { %p1326_p13 = por %p1325_p12, %p1324_p11 }
  0x1f   :  { %p1327_p0 = pnand %p1326_p13, %p1320_p10 }
  0x21   :  { %1330 = shalt.err (!%p1327_p0)
}
  0x22   :  { %50 = dma.hbm_to_vmem [thread:$0]  %s1645_s2, 512, %s45_s10, [#allocation6], %s1381_s26, %s1381_s26, %s1382_s27  }
  0x23   :  { %s1339_s15 = scalar_lea.vmem %s60_s12, 128  ;;  %p1344_p2 = scmp.lt.s32.totalorder %s60_s12, %s60_s12 }
  0x24   :  { %p1340_p1 = scmp.ne.s32.totalorder %s60_s12, %s1339_s15  ;;  %p1345_p3 = scmp.lt.s32.totalorder %s1339_s15, %s1339_s15 }
  0x26   :  { %p1346_p4 = por %p1345_p3, %p1344_p2 }
  0x28   :  { %p1347_p5 = pnand %p1346_p4, %p1340_p1 }
  0x2a   :  { %1350 = shalt.err (!%p1347_p5)
}
  0x2b   :  { %62 = dma.hbm_to_vmem [thread:$0]  %s1647_s4, 128, %s60_s12, [#allocation9]  }
  0x2c   :  { %1371 = dma.done.wait [#allocation3], 1024  }
  0x2d   :  { %1372 = vsyncadd [#allocation3], 4294966272 }
  0x2e   :  { %1373 = dma.done.wait [#allocation6], 1024  }
  0x2f   :  { %1374 = vsyncadd [#allocation6], 4294966272 }
  0x30   :  { %1375 = dma.done.wait [#allocation9], 128  }
  0x31   :  { %1376 = vsyncadd [#allocation9], 4294967168  ;;  %v226_v0 = vlaneseq  ;;  %v1385_v1 = vmov 0.0   ;;  %vm1386_vm0 = vmmov 0   ;;  %v1387_v4 = vmov 0.5   ;;  %v88_v6 = vld [vmem:[#allocation5 + $0x18] sm:$0xff] }
  0x32   :  { %1139 = vmatprep.subr.mxu1 %v1385_v1  ;;  %1147 = vmatprep.mubr.msk.f32.mxu1 %vm1386_vm0, %v1385_v1  ;;  %vm96_vm4 = vcmask 261120   ;;  %v87_v7 = vld [vmem:[#allocation5 + $0x10] sm:$0xff]  ;;  %v243_v8 = vld [vmem:[#allocation7 + $0x18] sm:$0xff]  ;;  %v77_v9 = vld [vmem:[#allocation2] sm:$0xff]  ;;  %s1388_s17 = smov 64   ;;  %s1389_s19 = smov 32  }
  0x33   :  { %v227_v2 = vand.u32 127, %v226_v0  ;;  %1119 = vmatprep.subr.mxu0 %v88_v6  ;;  %v86_v10 = vld [vmem:[#allocation5 + $0x8] sm:$0xff]  ;;  %1127 = vmatprep.mubr.msk.f32.mxu0 %vm96_vm4, %v77_v9  ;;  %v242_v12 = vld [vmem:[#allocation7 + $0x10] sm:$0xff]  ;;  %v240_v15 = vld [vmem:[#allocation7] sm:$0xff] }
  0x34   :  { %1120 = vmatpush3.msra.mxu0 %v88_v6  ;;  %v241_v13 = vld [vmem:[#allocation7 + $0x8] sm:$0xff]  ;;  %v85_v16 = vld [vmem:[#allocation5] sm:$0xff]  ;;  %v79_v58 = vld [vmem:[#allocation2 + $0x10] sm:$0xff] }
  0x35   :  { %vm228_vm1 = vcmp.ge.s32.totalorder %v227_v2, 64  ;;  %vm229_vm2 = vcmp.lt.s32.totalorder %v227_v2, 96  ;;  %1121 = vmatprep.subr.mxu0 %v87_v7  ;;  %v78_v18 = vld [vmem:[#allocation2 + $0x8] sm:$0xff]  ;;  %v248_v20 = vld [vmem:[#allocation8] sm:$0xff]  ;;  %v80_v59 = vld [vmem:[#allocation2 + $0x18] sm:$0xff] }
  0x36   :  { %vm1441_vm3 = vmand %vm228_vm1, %vm229_vm2  ;;  %1122 = vmatpush3.msra.mxu0 %v87_v7  ;;  %v1494_v22 = vld [vmem:[%s1646_s3] ss:$0 sm:$0xff]  ;;  %v82_v61 = vld [vmem:[#allocation2 + $0x28] sm:$0xff] }
  0x37   :  { %v1447_v5 = vsel %vm1441_vm3, 1.0, %v1387_v4  ;;  %1123 = vmatprep.subr.mxu0 %v86_v10  ;;  %v249_v33 = vld [vmem:[%s1648_s5] sm:$0xff]  ;;  %v83_v62 = vld [vmem:[#allocation2 + $0x30] sm:$0xff]  ;;  %v84_v63 = vld [vmem:[#allocation2 + $0x38] sm:$0xff]  ;;  %s1390_s5 = smov [#allocation10]  }
  0x38   :  { %v1450_v11 = vmul.f32 %v243_v8, %v1447_v5  ;;  %v1454_v14 = vmul.f32 %v242_v12, %v1447_v5  ;;  %v1458_v17 = vmul.f32 %v241_v13, %v1447_v5  ;;  %1124 = vmatpush3.msra.mxu0 %v86_v10  ;;  %v1463_v19 = vmul.f32 %v240_v15, %v1447_v5  ;;  %v81_v60 = vld [vmem:[#allocation2 + $0x20] sm:$0xff]  ;;  %s1039_s20 = sshll.u32 %s1390_s5, 4  ;;  %s1040_s20 = int_to_ptr.vmem [resolvable:$true] %s1039_s20 }
  0x39   :  { %1125 = vmatprep.subr.mxu0 %v85_v16  ;;  %s1351_s21 = scalar_lea.vmem %s1040_s20, 128  ;;  %p1356_p7 = scmp.lt.s32.totalorder %s1040_s20, %s1040_s20 }
  0x3a   :  { %1140 = vmatpush3.msra.mxu1 %v1450_v11  ;;  %1126 = vmatpush3.msra.mxu0 %v85_v16  ;;  %p1352_p6 = scmp.ne.s32.totalorder %s1040_s20, %s1351_s21  ;;  %p1357_p8 = scmp.lt.s32.totalorder %s1351_s21, %s1351_s21 }
  0x3b   :  { %1141 = vmatprep.subr.mxu1 %v1385_v1  ;;  %1128 = vmatmul.mubr.msk.f32.vlgmr.msra.gmra.mxu0 %vm96_vm4, %v78_v18 }
  0x3c   :  { %1142 = vmatpush3.msra.mxu1 %v1454_v14  ;;  %1161 = vmatprep.subr.mxu0 %v1385_v1  ;;  %p1358_p9 = por %p1357_p8, %p1356_p7 }
  0x3d   :  { %1143 = vmatprep.subr.mxu1 %v1385_v1  ;;  %1162 = vmatpush3.msra.mxu0 %v1450_v11 }
  0x3e   :  { %1144 = vmatpush3.msra.mxu1 %v1458_v17  ;;  %1163 = vmatprep.subr.mxu0 %v1385_v1  ;;  %p1359_p10 = pnand %p1358_p9, %p1352_p6 }
  0x3f   :  { %1145 = vmatprep.subr.mxu1 %v1385_v1  ;;  %1164 = vmatpush3.msra.mxu0 %v1454_v14 }
  0x40   :  { %1146 = vmatpush3.msra.mxu1 %v1463_v19  ;;  %1165 = vmatprep.subr.mxu0 %v1385_v1 }
  0x41   :  { %1148 = vmatmul.mubr.msk.f32.vlgmr.msra.gmra.mxu1 %vm96_vm4, %v248_v20  ;;  %1150 = vmatprep.subr.mxu1 %v1385_v1 }
  0x42   :  { %1151 = vmatpush3.msra.mxu1 %v1450_v11  ;;  %1158 = vmatprep.mubr.msk.f32.mxu1 %vm1386_vm0, %v1385_v1 }
  0x43   :  { %1152 = vmatprep.subr.mxu1 %v1385_v1  ;;  %1166 = vmatpush3.msra.mxu0 %v1458_v17 }
  0x44   :  { %1153 = vmatpush3.msra.mxu1 %v1454_v14  ;;  %1167 = vmatprep.subr.mxu0 %v1385_v1 }
  0x45   :  { %1154 = vmatprep.subr.mxu1 %v1385_v1  ;;  %1168 = vmatpush3.msra.mxu0 %v1463_v19 }
  0x46   :  { %1155 = vmatpush3.msra.mxu1 %v1458_v17  ;;  %1183 = vmatprep.subr.mxu0 %v1385_v1 }
  0x47   :  { %1156 = vmatprep.subr.mxu1 %v1385_v1  ;;  %1130 = vmatprep.mubr.msk.f32.mxu0 %vm96_vm4, %v79_v58 }
  0x48   :  { %1157 = vmatpush3.msra.mxu1 %v1463_v19  ;;  %1131 = vmatmul.mubr.msk.f32.gmra.mxu0 %vm96_vm4, %v80_v59 }
  0x49   :  { %1172 = vmatprep.subr.mxu1 %v1385_v1  ;;  %1133 = vmatprep.mubr.msk.f32.mxu0 %vm96_vm4, %v81_v60 }
  0x4c   :  { %1134 = vmatmul.mubr.msk.f32.gmra.mxu0 %vm96_vm4, %v82_v61 }
  0x4d   :  { %1136 = vmatprep.mubr.msk.f32.mxu0 %vm96_vm4, %v83_v62 }
  0x50   :  { %1137 = vmatmul.mubr.msk.f32.gmra.mxu0 %vm96_vm4, %v84_v63 }
  0x51   :  { %1169 = vmatprep.mubr.msk.f32.mxu0 %vm1386_vm0, %v1385_v1 }
  0xfb   :  { %v1129_v21 = vpop.f32.mrf.mxu0 }
  0xfc   :  { %v193_v44 = vadd.f32 %v1129_v21, %v1494_v22 }
  0xfd   :  { %v187_v23 = vpop.f32.mrf.mxu0 }
  0xfe   :  { %v188_v25 = vadd.f32 %v1494_v22, %v187_v23  ;;  %v233_v45 = vmul.f32 %v1447_v5, %v193_v44 }
 0x100   :  { %v232_v27 = vmul.f32 %v1447_v5, %v188_v25 }
 0x101   :  { %v319_v24 = vpop.f32.mrf.mxu1 }
 0x102   :  { %v323_v28 = vadd.f32 %v319_v24, %v232_v27 }
 0x103   :  { %v1149_v26 = vpop.f32.mrf.mxu1 }
 0x104   :  { %1239 = vtanh.f32 %v323_v28 }
 0x108   :  { %v1132_v7 = vpop.f32.mrf.mxu0 }
 0x10a   :  { %v197_v8 = vpop.f32.mrf.mxu0 }
 0x10b   :  { %v198_v13 = vadd.f32 %v1494_v22, %v197_v8 }
 0x10c   :  { %v1546_v9 = vpop.f32.mrf.mxu0 }
 0x10d   :  { %v234_v16 = vmul.f32 %v1447_v5, %v198_v13 }
 0x10e   :  { %v1548_v10 = vpop.f32.mrf.mxu0 }
 0x110   :  { %v1550_v12 = vpop.f32.mrf.mxu0 }
 0x111   :  { %v1240_v29 = vpop.eup %1239 }
 0x112   :  { %v325_v30 = vmul.f32 0.5, %v1240_v29  ;;  %v1553_v15 = vpop.f32.mrf.mxu0 }
 0x114   :  { %v326_v31 = vadd.f32 0.5, %v325_v30 }
 0x116   :  { %v327_v32 = vsel %vm1441_vm3, %v1240_v29, %v326_v31 }
 0x117   :  { %334 = vrot.lane.b32.xlu0 %v327_v32, %s1388_s17 }
 0x11b   :  { %329 = vrot.lane.b32.xlu0 %v249_v33, %s1389_s19 }
 0x189   :  { %v335_v34 = vpop.permute.xlu0 %334 }
 0x18a   :  { %v337_v35 = vmul.f32 %v335_v34, %v327_v32 }
 0x18c   :  { %339 = vrot.lane.b32.xlu1 %v337_v35, %s1389_s19 }
 0x18d   :  { %v330_v36 = vpop.permute.xlu0 %329 }
 0x18e   :  { %v332_v37 = vmul.f32 %v330_v36, %v327_v32  ;;  %v203_v36 = vadd.f32 %v1132_v7, %v1494_v22 }
 0x1fe   :  { %v340_v38 = vpop.permute.xlu1 %339 }
 0x1ff   :  { %v342_v39 = vadd.f32 %v340_v38, %v332_v37  ;;  %v235_v37 = vmul.f32 %v1447_v5, %v203_v36 }
 0x201   :  { %1241 = vtanh.f32 %v342_v39 }
 0x20e   :  { %v1242_v40 = vpop.eup %1241 }
 0x20f   :  { %345 = vrot.lane.b32.xlu1 %v1242_v40, %s1388_s17 }
 0x281   :  { %v346_v41 = vpop.permute.xlu1 %345 }
 0x282   :  { %v348_v42 = vmul.f32 %v346_v41, %v327_v32 }
 0x284   :  { %350 = vrot.lane.b32.xlu0 %v348_v42, %s1389_s19 }
 0x2f6   :  { %v351_v43 = vpop.permute.xlu0 %350 }
 0x2f7   :  { %1159 = vmatmul.mubr.msk.f32.vlgmr.msra.gmra.mxu1 %vm96_vm4, %v351_v43 }
 0x2f8   :  { %1173 = vmatpush3.msra.mxu1 %v1450_v11  ;;  %1180 = vmatprep.mubr.msk.f32.mxu1 %vm1386_vm0, %v1385_v1 }
 0x2f9   :  { %1174 = vmatprep.subr.mxu1 %v1385_v1 }
 0x2fa   :  { %1175 = vmatpush3.msra.mxu1 %v1454_v14 }
 0x2fb   :  { %1176 = vmatprep.subr.mxu1 %v1385_v1 }
 0x2fc   :  { %1177 = vmatpush3.msra.mxu1 %v1458_v17 }
 0x2fd   :  { %1178 = vmatprep.subr.mxu1 %v1385_v1 }
 0x2fe   :  { %1179 = vmatpush3.msra.mxu1 %v1463_v19 }
 0x2ff   :  { %1194 = vmatprep.subr.mxu1 %v1385_v1 }
 0x3b7   :  { %v420_v46 = vpop.f32.mrf.mxu1 }
 0x3b8   :  { %v424_v47 = vadd.f32 %v420_v46, %v233_v45 }
 0x3b9   :  { %v1160_v48 = vpop.f32.mrf.mxu1 }
 0x3ba   :  { %1243 = vtanh.f32 %v424_v47 }
 0x3c7   :  { %v1244_v49 = vpop.eup %1243 }
 0x3c8   :  { %v426_v50 = vmul.f32 0.5, %v1244_v49 }
 0x3ca   :  { %v427_v51 = vadd.f32 0.5, %v426_v50 }
 0x3cc   :  { %v428_v52 = vsel %vm1441_vm3, %v1244_v49, %v427_v51 }
 0x3cd   :  { %431 = vrot.lane.b32.xlu1 %v428_v52, %s1388_s17  ;;  %v429_v55 = vmul.f32 %v428_v52, %v342_v39 }
 0x43f   :  { %v432_v53 = vpop.permute.xlu1 %431 }
 0x440   :  { %v434_v54 = vmul.f32 %v432_v53, %v428_v52 }
 0x442   :  { %436 = vrot.lane.b32.xlu0 %v434_v54, %s1389_s19  ;;  %v208_v54 = vadd.f32 %v1494_v22, %v1548_v10 }
 0x4b4   :  { %v437_v56 = vpop.permute.xlu0 %436 }
 0x4b5   :  { %v439_v57 = vadd.f32 %v437_v56, %v429_v55  ;;  %v236_v55 = vmul.f32 %v1447_v5, %v208_v54 }
 0x4b7   :  { %1245 = vtanh.f32 %v439_v57 }
 0x4c4   :  { %v1246_v0 = vpop.eup %1245 }
 0x4c5   :  { %442 = vrot.lane.b32.xlu1 %v1246_v0, %s1388_s17 }
 0x537   :  { %v443_v2 = vpop.permute.xlu1 %442 }
 0x538   :  { %v445_v4 = vmul.f32 %v443_v2, %v428_v52 }
 0x53a   :  { %447 = vrot.lane.b32.xlu0 %v445_v4, %s1389_s19 }
 0x5ac   :  { %v448_v6 = vpop.permute.xlu0 %447 }
 0x5ad   :  { %1170 = vmatmul.mubr.msk.f32.vlgmr.msra.gmra.mxu0 %vm96_vm4, %v448_v6 }
 0x5ae   :  { %1184 = vmatpush3.msra.mxu0 %v1450_v11  ;;  %1191 = vmatprep.mubr.msk.f32.mxu0 %vm1386_vm0, %v1385_v1 }
 0x5af   :  { %1185 = vmatprep.subr.mxu0 %v1385_v1 }
 0x5b0   :  { %1186 = vmatpush3.msra.mxu0 %v1454_v14 }
 0x5b1   :  { %1187 = vmatprep.subr.mxu0 %v1385_v1 }
 0x5b2   :  { %1188 = vmatpush3.msra.mxu0 %v1458_v17 }
 0x5b3   :  { %1189 = vmatprep.subr.mxu0 %v1385_v1 }
 0x5b4   :  { %1190 = vmatpush3.msra.mxu0 %v1463_v19 }
 0x5b5   :  { %1205 = vmatprep.subr.mxu0 %v1385_v1 }
 0x66d   :  { %v517_v18 = vpop.f32.mrf.mxu0 }
 0x66e   :  { %v521_v20 = vadd.f32 %v517_v18, %v234_v16  ;;  %v213_v16 = vadd.f32 %v1546_v9, %v1494_v22 }
 0x66f   :  { %v1171_v21 = vpop.f32.mrf.mxu0 }
 0x670   :  { %1247 = vtanh.f32 %v521_v20 }
 0x67d   :  { %v1248_v23 = vpop.eup %1247 }
 0x67e   :  { %v523_v24 = vmul.f32 0.5, %v1248_v23 }
 0x680   :  { %v524_v25 = vadd.f32 0.5, %v523_v24 }
 0x682   :  { %v525_v26 = vsel %vm1441_vm3, %v1248_v23, %v524_v25 }
 0x683   :  { %528 = vrot.lane.b32.xlu1 %v525_v26, %s1388_s17  ;;  %v526_v29 = vmul.f32 %v525_v26, %v439_v57 }
 0x6f5   :  { %v529_v27 = vpop.permute.xlu1 %528 }
 0x6f6   :  { %v531_v28 = vmul.f32 %v529_v27, %v525_v26 }
 0x6f8   :  { %533 = vrot.lane.b32.xlu0 %v531_v28, %s1389_s19 }
 0x76a   :  { %v534_v30 = vpop.permute.xlu0 %533 }
 0x76b   :  { %v536_v31 = vadd.f32 %v534_v30, %v526_v29 }
 0x76d   :  { %1249 = vtanh.f32 %v536_v31 }
 0x77a   :  { %v1250_v32 = vpop.eup %1249 }
 0x77b   :  { %539 = vrot.lane.b32.xlu1 %v1250_v32, %s1388_s17 }
 0x7ed   :  { %v540_v33 = vpop.permute.xlu1 %539 }
 0x7ee   :  { %v542_v34 = vmul.f32 %v540_v33, %v525_v26 }
 0x7f0   :  { %544 = vrot.lane.b32.xlu0 %v542_v34, %s1389_s19 }
 0x862   :  { %v545_v35 = vpop.permute.xlu0 %544 }
 0x863   :  { %1181 = vmatmul.mubr.msk.f32.vlgmr.msra.gmra.mxu1 %vm96_vm4, %v545_v35 }
 0x864   :  { %1195 = vmatpush3.msra.mxu1 %v1450_v11  ;;  %1202 = vmatprep.mubr.msk.f32.mxu1 %vm1386_vm0, %v1385_v1 }
 0x865   :  { %1196 = vmatprep.subr.mxu1 %v1385_v1 }
 0x866   :  { %1197 = vmatpush3.msra.mxu1 %v1454_v14 }
 0x867   :  { %1198 = vmatprep.subr.mxu1 %v1385_v1 }
 0x868   :  { %1199 = vmatpush3.msra.mxu1 %v1458_v17 }
 0x869   :  { %1200 = vmatprep.subr.mxu1 %v1385_v1 }
 0x86a   :  { %1201 = vmatpush3.msra.mxu1 %v1463_v19 }
 0x86b   :  { %1216 = vmatprep.subr.mxu1 %v1385_v1 }
 0x923   :  { %v614_v38 = vpop.f32.mrf.mxu1 }
 0x924   :  { %v618_v39 = vadd.f32 %v614_v38, %v235_v37 }
 0x925   :  { %v1182_v40 = vpop.f32.mrf.mxu1 }
 0x926   :  { %1251 = vtanh.f32 %v618_v39 }
 0x933   :  { %v1252_v41 = vpop.eup %1251 }
 0x934   :  { %v620_v42 = vmul.f32 0.5, %v1252_v41 }
 0x936   :  { %v621_v43 = vadd.f32 0.5, %v620_v42 }
 0x938   :  { %v622_v44 = vsel %vm1441_vm3, %v1252_v41, %v621_v43 }
 0x939   :  { %625 = vrot.lane.b32.xlu1 %v622_v44, %s1388_s17  ;;  %v623_v47 = vmul.f32 %v622_v44, %v536_v31  ;;  %v218_v31 = vadd.f32 %v1494_v22, %v1553_v15 }
 0x93b   :  { %v238_v32 = vmul.f32 %v1447_v5, %v218_v31 }
 0x9ab   :  { %v626_v45 = vpop.permute.xlu1 %625 }
 0x9ac   :  { %v628_v46 = vmul.f32 %v626_v45, %v622_v44 }
 0x9ae   :  { %630 = vrot.lane.b32.xlu0 %v628_v46, %s1389_s19 }
 0xa20   :  { %v631_v48 = vpop.permute.xlu0 %630 }
 0xa21   :  { %v633_v49 = vadd.f32 %v631_v48, %v623_v47  ;;  %v223_v48 = vadd.f32 %v1550_v12, %v1494_v22 }
 0xa23   :  { %1253 = vtanh.f32 %v633_v49 }
 0xa30   :  { %v1254_v50 = vpop.eup %1253 }
 0xa31   :  { %636 = vrot.lane.b32.xlu1 %v1254_v50, %s1388_s17 }
 0xaa3   :  { %v637_v51 = vpop.permute.xlu1 %636 }
 0xaa4   :  { %v639_v52 = vmul.f32 %v637_v51, %v622_v44 }
 0xaa6   :  { %641 = vrot.lane.b32.xlu0 %v639_v52, %s1389_s19 }
 0xb18   :  { %v642_v53 = vpop.permute.xlu0 %641 }
 0xb19   :  { %1192 = vmatmul.mubr.msk.f32.vlgmr.msra.gmra.mxu0 %vm96_vm4, %v642_v53 }
 0xb1a   :  { %1206 = vmatpush3.msra.mxu0 %v1450_v11  ;;  %1213 = vmatprep.mubr.msk.f32.mxu0 %vm1386_vm0, %v1385_v1 }
 0xb1b   :  { %1207 = vmatprep.subr.mxu0 %v1385_v1 }
 0xb1c   :  { %1208 = vmatpush3.msra.mxu0 %v1454_v14 }
 0xb1d   :  { %1209 = vmatprep.subr.mxu0 %v1385_v1 }
 0xb1e   :  { %1210 = vmatpush3.msra.mxu0 %v1458_v17 }
 0xb1f   :  { %1211 = vmatprep.subr.mxu0 %v1385_v1 }
 0xb20   :  { %1212 = vmatpush3.msra.mxu0 %v1463_v19 }
 0xbd9   :  { %v711_v56 = vpop.f32.mrf.mxu0 }
 0xbda   :  { %v715_v57 = vadd.f32 %v711_v56, %v236_v55 }
 0xbdb   :  { %v1193_v58 = vpop.f32.mrf.mxu0 }
 0xbdc   :  { %1255 = vtanh.f32 %v715_v57 }
 0xbe9   :  { %v1256_v59 = vpop.eup %1255 }
 0xbea   :  { %v717_v60 = vmul.f32 0.5, %v1256_v59 }
 0xbec   :  { %v718_v61 = vadd.f32 0.5, %v717_v60 }
 0xbee   :  { %v719_v62 = vsel %vm1441_vm3, %v1256_v59, %v718_v61 }
 0xbef   :  { %722 = vrot.lane.b32.xlu1 %v719_v62, %s1388_s17  ;;  %v720_v2 = vmul.f32 %v719_v62, %v633_v49  ;;  %v239_v49 = vmul.f32 %v1447_v5, %v223_v48 }
 0xc61   :  { %v723_v63 = vpop.permute.xlu1 %722 }
 0xc62   :  { %v725_v0 = vmul.f32 %v723_v63, %v719_v62 }
 0xc64   :  { %727 = vrot.lane.b32.xlu0 %v725_v0, %s1389_s19 }
 0xcd6   :  { %v728_v4 = vpop.permute.xlu0 %727 }
 0xcd7   :  { %v730_v6 = vadd.f32 %v728_v4, %v720_v2 }
 0xcd9   :  { %1257 = vtanh.f32 %v730_v6 }
 0xce6   :  { %v1258_v7 = vpop.eup %1257 }
 0xce7   :  { %733 = vrot.lane.b32.xlu1 %v1258_v7, %s1388_s17 }
 0xd59   :  { %v734_v8 = vpop.permute.xlu1 %733 }
 0xd5a   :  { %v736_v10 = vmul.f32 %v734_v8, %v719_v62 }
 0xd5c   :  { %738 = vrot.lane.b32.xlu0 %v736_v10, %s1389_s19 }
 0xdce   :  { %v739_v13 = vpop.permute.xlu0 %738 }
 0xdcf   :  { %1203 = vmatmul.mubr.msk.f32.vlgmr.msra.gmra.mxu1 %vm96_vm4, %v739_v13 }
 0xdd0   :  { %1217 = vmatpush3.msra.mxu1 %v1450_v11  ;;  %1224 = vmatprep.mubr.msk.f32.mxu1 %vm1386_vm0, %v1385_v1  ;;  %v237_v11 = vmul.f32 %v1447_v5, %v213_v16 }
 0xdd1   :  { %1218 = vmatprep.subr.mxu1 %v1385_v1 }
 0xdd2   :  { %1219 = vmatpush3.msra.mxu1 %v1454_v14 }
 0xdd3   :  { %1220 = vmatprep.subr.mxu1 %v1385_v1 }
 0xdd4   :  { %1221 = vmatpush3.msra.mxu1 %v1458_v17 }
 0xdd5   :  { %1222 = vmatprep.subr.mxu1 %v1385_v1 }
 0xdd6   :  { %1223 = vmatpush3.msra.mxu1 %v1463_v19 }
 0xe8f   :  { %v808_v18 = vpop.f32.mrf.mxu1 }
 0xe90   :  { %v812_v20 = vadd.f32 %v808_v18, %v237_v11 }
 0xe91   :  { %v1204_v21 = vpop.f32.mrf.mxu1 }
 0xe92   :  { %1259 = vtanh.f32 %v812_v20 }
 0xe9f   :  { %v1260_v23 = vpop.eup %1259 }
 0xea0   :  { %v814_v24 = vmul.f32 0.5, %v1260_v23 }
 0xea2   :  { %v815_v14 = vadd.f32 0.5, %v814_v24 }
 0xea4   :  { %v816_v25 = vsel %vm1441_vm3, %v1260_v23, %v815_v14 }
 0xea5   :  { %819 = vrot.lane.b32.xlu1 %v816_v25, %s1388_s17  ;;  %v817_v19 = vmul.f32 %v816_v25, %v730_v6 }
 0xf17   :  { %v820_v1 = vpop.permute.xlu1 %819 }
 0xf18   :  { %v822_v17 = vmul.f32 %v820_v1, %v816_v25 }
 0xf1a   :  { %824 = vrot.lane.b32.xlu0 %v822_v17, %s1389_s19 }
 0xf8c   :  { %v825_v9 = vpop.permute.xlu0 %824 }
 0xf8d   :  { %v827_v26 = vadd.f32 %v825_v9, %v817_v19 }
 0xf8f   :  { %1261 = vtanh.f32 %v827_v26 }
 0xf9c   :  { %v1262_v27 = vpop.eup %1261 }
 0xf9d   :  { %830 = vrot.lane.b32.xlu1 %v1262_v27, %s1388_s17 }
0x100f   :  { %v831_v28 = vpop.permute.xlu1 %830 }
0x1010   :  { %v833_v29 = vmul.f32 %v831_v28, %v816_v25 }
0x1012   :  { %835 = vrot.lane.b32.xlu0 %v833_v29, %s1389_s19 }
0x1084   :  { %v836_v30 = vpop.permute.xlu0 %835 }
0x1085   :  { %1214 = vmatmul.mubr.msk.f32.vlgmr.msra.gmra.mxu0 %vm96_vm4, %v836_v30 }
0x1145   :  { %v905_v33 = vpop.f32.mrf.mxu0 }
0x1146   :  { %v909_v34 = vadd.f32 %v905_v33, %v238_v32 }
0x1147   :  { %v1215_v35 = vpop.f32.mrf.mxu0 }
0x1148   :  { %1263 = vtanh.f32 %v909_v34 }
0x1155   :  { %v1264_v36 = vpop.eup %1263 }
0x1156   :  { %v911_v37 = vmul.f32 0.5, %v1264_v36 }
0x1158   :  { %v912_v38 = vadd.f32 0.5, %v911_v37 }
0x115a   :  { %v913_v39 = vsel %vm1441_vm3, %v1264_v36, %v912_v38 }
0x115b   :  { %916 = vrot.lane.b32.xlu1 %v913_v39, %s1388_s17  ;;  %v914_v42 = vmul.f32 %v913_v39, %v827_v26 }
0x11cd   :  { %v917_v40 = vpop.permute.xlu1 %916 }
0x11ce   :  { %v919_v41 = vmul.f32 %v917_v40, %v913_v39 }
0x11d0   :  { %921 = vrot.lane.b32.xlu0 %v919_v41, %s1389_s19 }
0x1242   :  { %v922_v15 = vpop.permute.xlu0 %921 }
0x1243   :  { %v924_v43 = vadd.f32 %v922_v15, %v914_v42 }
0x1245   :  { %1265 = vtanh.f32 %v924_v43 }
0x1252   :  { %v1266_v44 = vpop.eup %1265 }
0x1253   :  { %927 = vrot.lane.b32.xlu1 %v1266_v44, %s1388_s17 }
0x12c5   :  { %v928_v45 = vpop.permute.xlu1 %927 }
0x12c6   :  { %v930_v46 = vmul.f32 %v928_v45, %v913_v39 }
0x12c8   :  { %932 = vrot.lane.b32.xlu0 %v930_v46, %s1389_s19 }
0x133a   :  { %v933_v47 = vpop.permute.xlu0 %932 }
0x133b   :  { %1225 = vmatmul.mubr.msk.f32.vlgmr.msra.gmra.mxu1 %vm96_vm4, %v933_v47 }
0x13fb   :  { %v1002_v50 = vpop.f32.mrf.mxu1 }
0x13fc   :  { %v1006_v51 = vadd.f32 %v1002_v50, %v239_v49 }
0x13fd   :  { %v1226_v52 = vpop.f32.mrf.mxu1 }
0x13fe   :  { %1267 = vtanh.f32 %v1006_v51 }
0x140b   :  { %v1268_v53 = vpop.eup %1267 }
0x140c   :  { %v1008_v54 = vmul.f32 0.5, %v1268_v53 }
0x140e   :  { %v1009_v55 = vadd.f32 0.5, %v1008_v54 }
0x1410   :  { %v1010_v56 = vsel %vm1441_vm3, %v1268_v53, %v1009_v55 }
0x1411   :  { %1013 = vrot.lane.b32.xlu1 %v1010_v56, %s1388_s17  ;;  %v1011_v59 = vmul.f32 %v1010_v56, %v924_v43 }
0x1483   :  { %v1014_v57 = vpop.permute.xlu1 %1013 }
0x1484   :  { %v1016_v58 = vmul.f32 %v1014_v57, %v1010_v56 }
0x1486   :  { %1018 = vrot.lane.b32.xlu0 %v1016_v58, %s1389_s19 }
0x14f8   :  { %v1019_v22 = vpop.permute.xlu0 %1018 }
0x14f9   :  { %v1021_v12 = vadd.f32 %v1019_v22, %v1011_v59 }
0x14fb   :  { %1269 = vtanh.f32 %v1021_v12 }
0x1508   :  { %v1270_v5 = vpop.eup %1269 }
0x1509   :  { %1024 = vrot.lane.b32.xlu1 %v1270_v5, %s1388_s17 }
0x157b   :  { %v1025_v60 = vpop.permute.xlu1 %1024 }
0x157c   :  { %v1027_v61 = vmul.f32 %v1025_v60, %v1010_v56 }
0x157e   :  { %1029 = vrot.lane.b32.xlu0 %v1027_v61, %s1389_s19 }
0x15f0   :  { %v1030_v3 = vpop.permute.xlu0 %1029 }
0x15f1   :  { %1032 = vst.msk [vmem:[#allocation10] sm:$0xff] %vm96_vm4, %v1030_v3 }
0x15f2   :  { %1362 = shalt.err (!%p1359_p10)
}
0x15f3   :  { %1042 = dma.vmem_to_hbm [thread:$0]  %s1040_s20, 128, %s1649_s6, [#allocation4]  }
0x15f4   :  { %1377 = dma.done.wait [#allocation4], 128  }
0x15f5   :  { %1378 = vsyncadd [#allocation4], 4294967168 }
0x15f6   :  { %1046 = vsyncpa [#allocation3], 1 }
0x15f7   :  { %1047 = vsyncpa [#allocation6], 1 }
0x15f8   :  { %1048 = vsyncpa [#allocation9], 1 }
0x15f9   :  { %1049 = vsyncpa [#allocation4], 1 }

</bundles_post_ra>
